<compile_context>
chip_gen: v7x
topology: tpu7x:2x2x1
jax: 0.10.0
libtpu: 0.0.40
codegen_flags: <defaults>
</compile_context>

<pallas_src>
import functools

import jax
import jax.numpy as jnp
from jax import lax
from jax.experimental import pallas as pl
from jax.experimental.pallas import tpu as pltpu


def _round_up(x, m):
    return (x + m - 1) // m * m


def rnn_md_recurrent_kernel(ext_ref, gmul_ref, gadd_ref, w_hh_ref,
                            w_fc_ref, b_fc_ref,
                            out_ref, act_ref, h_ref, *, oneminusalpha, tt):
    """One time-block of the CTRNN_MD recurrence + fused fc readout.

    ext_ref:  (Tt, B, Hp)  alpha * (x_t @ W_in + b_in), precomputed & padded
    gmul_ref: (B, Hp)      alpha * (sub_id @ mul_gates)
    gadd_ref: (B, Hp)      alpha * ((sub_id @ mul_gates) * b_hh + sub_id @ add_gates)
    w_hh_ref: (Hp, Hp)     recurrent weight, pre-transposed to (in, out)
    w_fc_ref: (Hp, Op)     readout weight, pre-transposed
    b_fc_ref: (1, Op)
    out_ref:  (Tt, B, Op)
    act_ref:  (Tt, B, Hp)
    h_ref:    (B, Hp)      VMEM scratch carrying the hidden state across grid blocks
    """
    blk = pl.program_id(0)

    # init_hidden -> zeros, only at the first time block.
    @pl.when(blk == 0)
    def _():
        h_ref[...] = jnp.zeros_like(h_ref)

    g_mul = gmul_ref[...]
    g_add = gadd_ref[...]
    w_hh = w_hh_ref[...]

    def step(i, h):
        # Single small matmul per step; everything else is folded into ext/g_mul/g_add.
        rec = jnp.dot(h, w_hh, preferred_element_type=jnp.float32)
        h_new = jnp.maximum(
            h * oneminusalpha + ext_ref[i] + g_mul * rec + g_add, 0.0)
        act_ref[i] = h_new
        return h_new

    h_last = lax.fori_loop(0, tt, step, h_ref[...], unroll=True)
    h_ref[...] = h_last

    # Batched, lane-dense fc readout over the whole time block:
    # (Tt*B, Hp) @ (Hp, Op) instead of one masked (B, O) store per timestep.
    tt_b, b, hp = act_ref.shape
    acts = act_ref[...].reshape(tt_b * b, hp)
    out = jnp.dot(acts, w_fc_ref[...],
                  preferred_element_type=jnp.float32) + b_fc_ref[...]
    out_ref[...] = out.reshape(tt_b, b, out.shape[-1])


def rnn_md_forward(x, sub_id, params, alpha, *, time_block=8):
    T, B, I = x.shape
    H = params["w_hh"].shape[0]
    O = params["w_fc"].shape[1]
    assert T % time_block == 0, "T must be divisible by the time block"
    Tt = time_block

    # Pad lane dims to hardware tiles for unmasked, lane-dense loads/stores.
    Hp = _round_up(H, 128)
    Op = _round_up(O, 128)

    oneminusalpha = 1.0 - alpha

    # ---- Hoisted, time-invariant precompute (wrapper side, one big matmul) ----
    # ext_a = alpha * (x @ W_in + b_in), computed for all T at once.
    ext = alpha * (x.reshape(T * B, I) @ params["w_in"] + params["b_in"])
    ext = ext.reshape(T, B, H)
    # MD gating and b_hh folded into per-batch (B, H) terms, alpha folded in too:
    #   rec*alpha = alpha*g_mul*(h@W_hh) + alpha*(g_mul*b_hh + g_add)
    g_mul = sub_id @ params["mul_gates"]
    g_mul_a = alpha * g_mul
    g_add_a = alpha * (g_mul * params["b_hh"] + sub_id @ params["add_gates"])

    def pad_last(a, n):
        pad = n - a.shape[-1]
        if pad == 0:
            return a
        return jnp.pad(a, [(0, 0)] * (a.ndim - 1) + [(0, pad)])

    ext_p = pad_last(ext, Hp)                                   # (T, B, Hp)
    g_mul_p = pad_last(g_mul_a, Hp)                             # (B, Hp)
    g_add_p = pad_last(g_add_a, Hp)                             # (B, Hp)
    w_hh_p = jnp.pad(params["w_hh"], ((0, Hp - H), (0, Hp - H)))
    w_fc_p = jnp.pad(params["w_fc"], ((0, Hp - H), (0, Op - O)))
    b_fc_p = pad_last(params["b_fc"], Op)

    kernel = functools.partial(rnn_md_recurrent_kernel,
                               oneminusalpha=oneminusalpha, tt=Tt)
    full2d = lambda t: (0, 0)

    out_p, act_p = pl.pallas_call(
        kernel,
        out_shape=(
            jax.ShapeDtypeStruct((T, B, Op), jnp.float32),
            jax.ShapeDtypeStruct((T, B, Hp), jnp.float32),
        ),
        grid_spec=pltpu.PrefetchScalarGridSpec(
            num_scalar_prefetch=0,
            grid=(T // Tt,),
            in_specs=[
                pl.BlockSpec((Tt, B, Hp), lambda t: (t, 0, 0)),   # ext (time-blocked)
                pl.BlockSpec((B, Hp), full2d),                    # alpha * g_mul
                pl.BlockSpec((B, Hp), full2d),                    # alpha * (g_mul*b_hh + g_add)
                pl.BlockSpec((Hp, Hp), full2d),                   # W_hh^T
                pl.BlockSpec((Hp, Op), full2d),                   # W_fc^T
                pl.BlockSpec((1, Op), full2d),                    # b_fc
            ],
            out_specs=[
                pl.BlockSpec((Tt, B, Op), lambda t: (t, 0, 0)),   # out
                pl.BlockSpec((Tt, B, Hp), lambda t: (t, 0, 0)),   # rnn_activity
            ],
            scratch_shapes=[pltpu.VMEM((B, Hp), jnp.float32)],    # hidden carry
        ),
        compiler_params=pltpu.CompilerParams(
            dimension_semantics=("arbitrary",),   # recurrence -> sequential grid
        ),
    )(ext_p, g_mul_p, g_add_p, w_hh_p, w_fc_p, b_fc_p)

    # Slice away lane padding.
    return out_p[..., :O], act_p[..., :H]


def reference_forward(x, sub_id, params, alpha):
    """Pure-JAX reference mirroring the PyTorch module (no folding)."""
    g_mul = sub_id @ params["mul_gates"]
    g_add = sub_id @ params["add_gates"]

    def step(h, x_t):
        ext = x_t @ params["w_in"] + params["b_in"][0]
        rec = h @ params["w_hh"] + params["b_hh"][0]
        rec = g_mul * rec + g_add
        h_new = jnp.maximum(h * (1.0 - alpha) + (ext + rec) * alpha, 0.0)
        return h_new, h_new

    h0 = jnp.zeros((x.shape[1], params["w_hh"].shape[0]), jnp.float32)
    _, acts = jax.lax.scan(step, h0, x)
    outs = acts @ params["w_fc"] + params["b_fc"][0]
    return outs, acts


def init_params(key, input_size, hidden_size, output_size, md_size):
    """Deterministic synthetic parameters matching CTRNN_MD / RNN_MD shapes."""
    ks = jax.random.split(key, 8)
    g = 0.5

    lim_in = 1.0 / jnp.sqrt(input_size)
    w_in = jax.random.uniform(ks[0], (input_size, hidden_size),
                              minval=-lim_in, maxval=lim_in, dtype=jnp.float32)
    b_in = jax.random.uniform(ks[1], (1, hidden_size),
                              minval=-lim_in, maxval=lim_in, dtype=jnp.float32)

    # h2h: weight = eye(H) * g (reset_parameters), bias default init, stored transposed
    w_hh = jnp.eye(hidden_size, dtype=jnp.float32) * g
    lim_h = 1.0 / jnp.sqrt(hidden_size)
    b_hh = jax.random.uniform(ks[2], (1, hidden_size),
                              minval=-lim_h, maxval=lim_h, dtype=jnp.float32)

    # mul_gates: sparse_with_mean(...) then relu -> approximate deterministically
    mul_gates = jax.nn.relu(
        0.5 + 0.2 * jax.random.normal(ks[3], (md_size, hidden_size), dtype=jnp.float32))

    # add_gates: xavier_uniform with gain for relu
    gain = jnp.sqrt(2.0)
    lim_x = gain * jnp.sqrt(6.0 / (md_size + hidden_size))
    add_gates = jax.random.uniform(ks[4], (md_size, hidden_size),
                                   minval=-lim_x, maxval=lim_x, dtype=jnp.float32)

    # fc: nn.Linear(hidden_size, output_size)
    w_fc = jax.random.uniform(ks[5], (hidden_size, output_size),
                              minval=-lim_h, maxval=lim_h, dtype=jnp.float32)
    b_fc = jax.random.uniform(ks[6], (1, output_size),
                              minval=-lim_h, maxval=lim_h, dtype=jnp.float32)

    return dict(w_in=w_in, b_in=b_in, w_hh=w_hh, b_hh=b_hh,
                mul_gates=mul_gates, add_gates=add_gates,
                w_fc=w_fc, b_fc=b_fc)


if __name__ == "__main__":
    # Small shapes consistent with the module's forward.
    T, B = 16, 8                # seq_len, batch (T=16 with Tt=8 -> 2 grid blocks,
                                # exercising the cross-block hidden-state carry)
    INPUT, HIDDEN, OUTPUT, MD = 16, 32, 8, 4
    DT, TAU = 100.0, 200.0
    ALPHA = DT / TAU            # CTRNN alpha

    key = jax.random.PRNGKey(0)
    k_x, k_p, k_s = jax.random.split(key, 3)

    x = jax.random.normal(k_x, (T, B, INPUT), dtype=jnp.float32)
    # sub_id: one-hot MD context per batch element
    sub_idx = jax.random.randint(k_s, (B,), 0, MD)
    sub_id = jax.nn.one_hot(sub_idx, MD, dtype=jnp.float32)

    params = init_params(k_p, INPUT, HIDDEN, OUTPUT, MD)

    out, act = rnn_md_forward(x, sub_id, params, ALPHA, time_block=8)
    out = jax.block_until_ready(out)
    act = jax.block_until_ready(act)

    out_ref, act_ref = reference_forward(x, sub_id, params, ALPHA)
    assert out.shape == (T, B, OUTPUT) and act.shape == (T, B, HIDDEN)
    assert jnp.allclose(out, out_ref, atol=1e-5, rtol=1e-5)
    assert jnp.allclose(act, act_ref, atol=1e-5, rtol=1e-5)

    print("KERNEL_OK")
</pallas_src>

<mosaic_0001>
module attributes {stable_mosaic.version = 11 : i64} {
  func.func @rnn_md_recurrent_kernel(%arg0: i32, %arg1: memref<8x8x128xf32, #tpu.memory_space<vmem>>, %arg2: memref<8x128xf32, #tpu.memory_space<vmem>>, %arg3: memref<8x128xf32, #tpu.memory_space<vmem>>, %arg4: memref<128x128xf32, #tpu.memory_space<vmem>>, %arg5: memref<128x128xf32, #tpu.memory_space<vmem>>, %arg6: memref<1x128xf32, #tpu.memory_space<vmem>>, %arg7: memref<8x8x128xf32, #tpu.memory_space<vmem>>, %arg8: memref<8x8x128xf32, #tpu.memory_space<vmem>>, %arg9: memref<8x128xf32, #tpu.memory_space<vmem>>) attributes {dimension_semantics = [#tpu.dimension_semantics<arbitrary>], iteration_bounds = array<i64: 2>, scalar_prefetch = 0 : i64, scratch_operands = 1 : i64, tpu.core_type = #tpu.core_type<tc>, window_params = [{transform_indices = @transform_0, window_bounds = array<i64: 8, 8, 128>}, {pipeline_mode = #tpu.pipeline_mode<synchronous>, transform_indices = @transform_1, window_bounds = array<i64: 8, 128>}, {pipeline_mode = #tpu.pipeline_mode<synchronous>, transform_indices = @transform_2, window_bounds = array<i64: 8, 128>}, {pipeline_mode = #tpu.pipeline_mode<synchronous>, transform_indices = @transform_3, window_bounds = array<i64: 128, 128>}, {pipeline_mode = #tpu.pipeline_mode<synchronous>, transform_indices = @transform_4, window_bounds = array<i64: 128, 128>}, {pipeline_mode = #tpu.pipeline_mode<synchronous>, transform_indices = @transform_5, window_bounds = array<i64: 1, 128>}, {transform_indices = @transform_6, window_bounds = array<i64: 8, 8, 128>}, {transform_indices = @transform_7, window_bounds = array<i64: 8, 8, 128>}]} {
    %c0_i32 = arith.constant 0 : i32
    %0 = arith.cmpi eq, %arg0, %c0_i32 : i32
    %1 = arith.extui %0 : i1 to i32
    %c0_i32_0 = arith.constant 0 : i32
    %2 = arith.cmpi ne, %1, %c0_i32_0 : i32
    scf.if %2 {
      %cst_77 = arith.constant 0.000000e+00 : f32
      %145 = vector.broadcast %cst_77 : f32 to vector<8x128xf32>
      %c0_78 = arith.constant 0 : index
      %c0_79 = arith.constant 0 : index
      %146 = vector.load %arg9[%c0_78, %c0_79] : memref<8x128xf32, #tpu.memory_space<vmem>>, vector<8x128xf32>
      tpu.vector_store %arg9[%c0_78, %c0_79], %145 {strides = array<i32>} : memref<8x128xf32, #tpu.memory_space<vmem>>, vector<8x128xf32>,
    } else {
    }
    %c0 = arith.constant 0 : index
    %c0_1 = arith.constant 0 : index
    %3 = vector.load %arg2[%c0, %c0_1] : memref<8x128xf32, #tpu.memory_space<vmem>>, vector<8x128xf32>
    %c0_2 = arith.constant 0 : index
    %c0_3 = arith.constant 0 : index
    %4 = vector.load %arg3[%c0_2, %c0_3] : memref<8x128xf32, #tpu.memory_space<vmem>>, vector<8x128xf32>
    %c0_4 = arith.constant 0 : index
    %c0_5 = arith.constant 0 : index
    %5 = vector.load %arg4[%c0_4, %c0_5] : memref<128x128xf32, #tpu.memory_space<vmem>>, vector<128x128xf32>
    %c0_6 = arith.constant 0 : index
    %c0_7 = arith.constant 0 : index
    %6 = vector.load %arg9[%c0_6, %c0_7] : memref<8x128xf32, #tpu.memory_space<vmem>>, vector<8x128xf32>
    %c0_i32_8 = arith.constant 0 : i32
    %cst = arith.constant dense<0.000000e+00> : vector<8x128xf32>
    %7 = tpu.matmul %6, %5, %cst {dimension_numbers = #tpu.dot_dimension_numbers<[1], [0], [0], [1], [0, 0, 1, 1], [], []>} : vector<8x128xf32>, vector<128x128xf32>, vector<8x128xf32> -> vector<8x128xf32>
    %cst_9 = arith.constant 5.000000e-01 : f32
    %8 = vector.broadcast %cst_9 : f32 to vector<8x128xf32>
    %9 = arith.mulf %6, %8 : vector<8x128xf32>
    %10 = arith.index_cast %c0_i32_8 : i32 to index
    %c0_10 = arith.constant 0 : index
    %c0_11 = arith.constant 0 : index
    %11 = vector.load %arg1[%10, %c0_10, %c0_11] : memref<8x8x128xf32, #tpu.memory_space<vmem>>, vector<1x8x128xf32>
    %12 = vector.shape_cast %11 : vector<1x8x128xf32> to vector<8x128xf32>
    %13 = arith.addf %9, %12 : vector<8x128xf32>
    %14 = arith.mulf %3, %7 : vector<8x128xf32>
    %15 = arith.addf %13, %14 : vector<8x128xf32>
    %16 = arith.addf %15, %4 : vector<8x128xf32>
    %cst_12 = arith.constant 0.000000e+00 : f32
    %17 = vector.broadcast %cst_12 : f32 to vector<8x128xf32>
    %18 = arith.maximumf %16, %17 : vector<8x128xf32>
    %19 = arith.index_cast %c0_i32_8 : i32 to index
    %c0_13 = arith.constant 0 : index
    %c0_14 = arith.constant 0 : index
    %20 = vector.load %arg8[%19, %c0_13, %c0_14] : memref<8x8x128xf32, #tpu.memory_space<vmem>>, vector<1x8x128xf32>
    %21 = vector.shape_cast %20 : vector<1x8x128xf32> to vector<8x128xf32>
    %22 = vector.shape_cast %18 : vector<8x128xf32> to vector<1x8x128xf32>
    tpu.vector_store %arg8[%19, %c0_13, %c0_14], %22 {strides = array<i32>} : memref<8x8x128xf32, #tpu.memory_space<vmem>>, vector<1x8x128xf32>,
    %c1_i32 = arith.constant 1 : i32
    %cst_15 = arith.constant dense<0.000000e+00> : vector<8x128xf32>
    %23 = tpu.matmul %18, %5, %cst_15 {dimension_numbers = #tpu.dot_dimension_numbers<[1], [0], [0], [1], [0, 0, 1, 1], [], []>} : vector<8x128xf32>, vector<128x128xf32>, vector<8x128xf32> -> vector<8x128xf32>
    %cst_16 = arith.constant 5.000000e-01 : f32
    %24 = vector.broadcast %cst_16 : f32 to vector<8x128xf32>
    %25 = arith.mulf %18, %24 : vector<8x128xf32>
    %26 = arith.index_cast %c1_i32 : i32 to index
    %c0_17 = arith.constant 0 : index
    %c0_18 = arith.constant 0 : index
    %27 = vector.load %arg1[%26, %c0_17, %c0_18] : memref<8x8x128xf32, #tpu.memory_space<vmem>>, vector<1x8x128xf32>
    %28 = vector.shape_cast %27 : vector<1x8x128xf32> to vector<8x128xf32>
    %29 = arith.addf %25, %28 : vector<8x128xf32>
    %30 = arith.mulf %3, %23 : vector<8x128xf32>
    %31 = arith.addf %29, %30 : vector<8x128xf32>
    %32 = arith.addf %31, %4 : vector<8x128xf32>
    %cst_19 = arith.constant 0.000000e+00 : f32
    %33 = vector.broadcast %cst_19 : f32 to vector<8x128xf32>
    %34 = arith.maximumf %32, %33 : vector<8x128xf32>
    %35 = arith.index_cast %c1_i32 : i32 to index
    %c0_20 = arith.constant 0 : index
    %c0_21 = arith.constant 0 : index
    %36 = vector.load %arg8[%35, %c0_20, %c0_21] : memref<8x8x128xf32, #tpu.memory_space<vmem>>, vector<1x8x128xf32>
    %37 = vector.shape_cast %36 : vector<1x8x128xf32> to vector<8x128xf32>
    %38 = vector.shape_cast %34 : vector<8x128xf32> to vector<1x8x128xf32>
    tpu.vector_store %arg8[%35, %c0_20, %c0_21], %38 {strides = array<i32>} : memref<8x8x128xf32, #tpu.memory_space<vmem>>, vector<1x8x128xf32>,
    %c2_i32 = arith.constant 2 : i32
    %cst_22 = arith.constant dense<0.000000e+00> : vector<8x128xf32>
    %39 = tpu.matmul %34, %5, %cst_22 {dimension_numbers = #tpu.dot_dimension_numbers<[1], [0], [0], [1], [0, 0, 1, 1], [], []>} : vector<8x128xf32>, vector<128x128xf32>, vector<8x128xf32> -> vector<8x128xf32>
    %cst_23 = arith.constant 5.000000e-01 : f32
    %40 = vector.broadcast %cst_23 : f32 to vector<8x128xf32>
    %41 = arith.mulf %34, %40 : vector<8x128xf32>
    %42 = arith.index_cast %c2_i32 : i32 to index
    %c0_24 = arith.constant 0 : index
    %c0_25 = arith.constant 0 : index
    %43 = vector.load %arg1[%42, %c0_24, %c0_25] : memref<8x8x128xf32, #tpu.memory_space<vmem>>, vector<1x8x128xf32>
    %44 = vector.shape_cast %43 : vector<1x8x128xf32> to vector<8x128xf32>
    %45 = arith.addf %41, %44 : vector<8x128xf32>
    %46 = arith.mulf %3, %39 : vector<8x128xf32>
    %47 = arith.addf %45, %46 : vector<8x128xf32>
    %48 = arith.addf %47, %4 : vector<8x128xf32>
    %cst_26 = arith.constant 0.000000e+00 : f32
    %49 = vector.broadcast %cst_26 : f32 to vector<8x128xf32>
    %50 = arith.maximumf %48, %49 : vector<8x128xf32>
    %51 = arith.index_cast %c2_i32 : i32 to index
    %c0_27 = arith.constant 0 : index
    %c0_28 = arith.constant 0 : index
    %52 = vector.load %arg8[%51, %c0_27, %c0_28] : memref<8x8x128xf32, #tpu.memory_space<vmem>>, vector<1x8x128xf32>
    %53 = vector.shape_cast %52 : vector<1x8x128xf32> to vector<8x128xf32>
    %54 = vector.shape_cast %50 : vector<8x128xf32> to vector<1x8x128xf32>
    tpu.vector_store %arg8[%51, %c0_27, %c0_28], %54 {strides = array<i32>} : memref<8x8x128xf32, #tpu.memory_space<vmem>>, vector<1x8x128xf32>,
    %c3_i32 = arith.constant 3 : i32
    %cst_29 = arith.constant dense<0.000000e+00> : vector<8x128xf32>
    %55 = tpu.matmul %50, %5, %cst_29 {dimension_numbers = #tpu.dot_dimension_numbers<[1], [0], [0], [1], [0, 0, 1, 1], [], []>} : vector<8x128xf32>, vector<128x128xf32>, vector<8x128xf32> -> vector<8x128xf32>
    %cst_30 = arith.constant 5.000000e-01 : f32
    %56 = vector.broadcast %cst_30 : f32 to vector<8x128xf32>
    %57 = arith.mulf %50, %56 : vector<8x128xf32>
    %58 = arith.index_cast %c3_i32 : i32 to index
    %c0_31 = arith.constant 0 : index
    %c0_32 = arith.constant 0 : index
    %59 = vector.load %arg1[%58, %c0_31, %c0_32] : memref<8x8x128xf32, #tpu.memory_space<vmem>>, vector<1x8x128xf32>
    %60 = vector.shape_cast %59 : vector<1x8x128xf32> to vector<8x128xf32>
    %61 = arith.addf %57, %60 : vector<8x128xf32>
    %62 = arith.mulf %3, %55 : vector<8x128xf32>
    %63 = arith.addf %61, %62 : vector<8x128xf32>
    %64 = arith.addf %63, %4 : vector<8x128xf32>
    %cst_33 = arith.constant 0.000000e+00 : f32
    %65 = vector.broadcast %cst_33 : f32 to vector<8x128xf32>
    %66 = arith.maximumf %64, %65 : vector<8x128xf32>
    %67 = arith.index_cast %c3_i32 : i32 to index
    %c0_34 = arith.constant 0 : index
    %c0_35 = arith.constant 0 : index
    %68 = vector.load %arg8[%67, %c0_34, %c0_35] : memref<8x8x128xf32, #tpu.memory_space<vmem>>, vector<1x8x128xf32>
    %69 = vector.shape_cast %68 : vector<1x8x128xf32> to vector<8x128xf32>
    %70 = vector.shape_cast %66 : vector<8x128xf32> to vector<1x8x128xf32>
    tpu.vector_store %arg8[%67, %c0_34, %c0_35], %70 {strides = array<i32>} : memref<8x8x128xf32, #tpu.memory_space<vmem>>, vector<1x8x128xf32>,
    %c4_i32 = arith.constant 4 : i32
    %cst_36 = arith.constant dense<0.000000e+00> : vector<8x128xf32>
    %71 = tpu.matmul %66, %5, %cst_36 {dimension_numbers = #tpu.dot_dimension_numbers<[1], [0], [0], [1], [0, 0, 1, 1], [], []>} : vector<8x128xf32>, vector<128x128xf32>, vector<8x128xf32> -> vector<8x128xf32>
    %cst_37 = arith.constant 5.000000e-01 : f32
    %72 = vector.broadcast %cst_37 : f32 to vector<8x128xf32>
    %73 = arith.mulf %66, %72 : vector<8x128xf32>
    %74 = arith.index_cast %c4_i32 : i32 to index
    %c0_38 = arith.constant 0 : index
    %c0_39 = arith.constant 0 : index
    %75 = vector.load %arg1[%74, %c0_38, %c0_39] : memref<8x8x128xf32, #tpu.memory_space<vmem>>, vector<1x8x128xf32>
    %76 = vector.shape_cast %75 : vector<1x8x128xf32> to vector<8x128xf32>
    %77 = arith.addf %73, %76 : vector<8x128xf32>
    %78 = arith.mulf %3, %71 : vector<8x128xf32>
    %79 = arith.addf %77, %78 : vector<8x128xf32>
    %80 = arith.addf %79, %4 : vector<8x128xf32>
    %cst_40 = arith.constant 0.000000e+00 : f32
    %81 = vector.broadcast %cst_40 : f32 to vector<8x128xf32>
    %82 = arith.maximumf %80, %81 : vector<8x128xf32>
    %83 = arith.index_cast %c4_i32 : i32 to index
    %c0_41 = arith.constant 0 : index
    %c0_42 = arith.constant 0 : index
    %84 = vector.load %arg8[%83, %c0_41, %c0_42] : memref<8x8x128xf32, #tpu.memory_space<vmem>>, vector<1x8x128xf32>
    %85 = vector.shape_cast %84 : vector<1x8x128xf32> to vector<8x128xf32>
    %86 = vector.shape_cast %82 : vector<8x128xf32> to vector<1x8x128xf32>
    tpu.vector_store %arg8[%83, %c0_41, %c0_42], %86 {strides = array<i32>} : memref<8x8x128xf32, #tpu.memory_space<vmem>>, vector<1x8x128xf32>,
    %c5_i32 = arith.constant 5 : i32
    %cst_43 = arith.constant dense<0.000000e+00> : vector<8x128xf32>
    %87 = tpu.matmul %82, %5, %cst_43 {dimension_numbers = #tpu.dot_dimension_numbers<[1], [0], [0], [1], [0, 0, 1, 1], [], []>} : vector<8x128xf32>, vector<128x128xf32>, vector<8x128xf32> -> vector<8x128xf32>
    %cst_44 = arith.constant 5.000000e-01 : f32
    %88 = vector.broadcast %cst_44 : f32 to vector<8x128xf32>
    %89 = arith.mulf %82, %88 : vector<8x128xf32>
    %90 = arith.index_cast %c5_i32 : i32 to index
    %c0_45 = arith.constant 0 : index
    %c0_46 = arith.constant 0 : index
    %91 = vector.load %arg1[%90, %c0_45, %c0_46] : memref<8x8x128xf32, #tpu.memory_space<vmem>>, vector<1x8x128xf32>
    %92 = vector.shape_cast %91 : vector<1x8x128xf32> to vector<8x128xf32>
    %93 = arith.addf %89, %92 : vector<8x128xf32>
    %94 = arith.mulf %3, %87 : vector<8x128xf32>
    %95 = arith.addf %93, %94 : vector<8x128xf32>
    %96 = arith.addf %95, %4 : vector<8x128xf32>
    %cst_47 = arith.constant 0.000000e+00 : f32
    %97 = vector.broadcast %cst_47 : f32 to vector<8x128xf32>
    %98 = arith.maximumf %96, %97 : vector<8x128xf32>
    %99 = arith.index_cast %c5_i32 : i32 to index
    %c0_48 = arith.constant 0 : index
    %c0_49 = arith.constant 0 : index
    %100 = vector.load %arg8[%99, %c0_48, %c0_49] : memref<8x8x128xf32, #tpu.memory_space<vmem>>, vector<1x8x128xf32>
    %101 = vector.shape_cast %100 : vector<1x8x128xf32> to vector<8x128xf32>
    %102 = vector.shape_cast %98 : vector<8x128xf32> to vector<1x8x128xf32>
    tpu.vector_store %arg8[%99, %c0_48, %c0_49], %102 {strides = array<i32>} : memref<8x8x128xf32, #tpu.memory_space<vmem>>, vector<1x8x128xf32>,
    %c6_i32 = arith.constant 6 : i32
    %cst_50 = arith.constant dense<0.000000e+00> : vector<8x128xf32>
    %103 = tpu.matmul %98, %5, %cst_50 {dimension_numbers = #tpu.dot_dimension_numbers<[1], [0], [0], [1], [0, 0, 1, 1], [], []>} : vector<8x128xf32>, vector<128x128xf32>, vector<8x128xf32> -> vector<8x128xf32>
    %cst_51 = arith.constant 5.000000e-01 : f32
    %104 = vector.broadcast %cst_51 : f32 to vector<8x128xf32>
    %105 = arith.mulf %98, %104 : vector<8x128xf32>
    %106 = arith.index_cast %c6_i32 : i32 to index
    %c0_52 = arith.constant 0 : index
    %c0_53 = arith.constant 0 : index
    %107 = vector.load %arg1[%106, %c0_52, %c0_53] : memref<8x8x128xf32, #tpu.memory_space<vmem>>, vector<1x8x128xf32>
    %108 = vector.shape_cast %107 : vector<1x8x128xf32> to vector<8x128xf32>
    %109 = arith.addf %105, %108 : vector<8x128xf32>
    %110 = arith.mulf %3, %103 : vector<8x128xf32>
    %111 = arith.addf %109, %110 : vector<8x128xf32>
    %112 = arith.addf %111, %4 : vector<8x128xf32>
    %cst_54 = arith.constant 0.000000e+00 : f32
    %113 = vector.broadcast %cst_54 : f32 to vector<8x128xf32>
    %114 = arith.maximumf %112, %113 : vector<8x128xf32>
    %115 = arith.index_cast %c6_i32 : i32 to index
    %c0_55 = arith.constant 0 : index
    %c0_56 = arith.constant 0 : index
    %116 = vector.load %arg8[%115, %c0_55, %c0_56] : memref<8x8x128xf32, #tpu.memory_space<vmem>>, vector<1x8x128xf32>
    %117 = vector.shape_cast %116 : vector<1x8x128xf32> to vector<8x128xf32>
    %118 = vector.shape_cast %114 : vector<8x128xf32> to vector<1x8x128xf32>
    tpu.vector_store %arg8[%115, %c0_55, %c0_56], %118 {strides = array<i32>} : memref<8x8x128xf32, #tpu.memory_space<vmem>>, vector<1x8x128xf32>,
    %c7_i32 = arith.constant 7 : i32
    %cst_57 = arith.constant dense<0.000000e+00> : vector<8x128xf32>
    %119 = tpu.matmul %114, %5, %cst_57 {dimension_numbers = #tpu.dot_dimension_numbers<[1], [0], [0], [1], [0, 0, 1, 1], [], []>} : vector<8x128xf32>, vector<128x128xf32>, vector<8x128xf32> -> vector<8x128xf32>
    %cst_58 = arith.constant 5.000000e-01 : f32
    %120 = vector.broadcast %cst_58 : f32 to vector<8x128xf32>
    %121 = arith.mulf %114, %120 : vector<8x128xf32>
    %122 = arith.index_cast %c7_i32 : i32 to index
    %c0_59 = arith.constant 0 : index
    %c0_60 = arith.constant 0 : index
    %123 = vector.load %arg1[%122, %c0_59, %c0_60] : memref<8x8x128xf32, #tpu.memory_space<vmem>>, vector<1x8x128xf32>
    %124 = vector.shape_cast %123 : vector<1x8x128xf32> to vector<8x128xf32>
    %125 = arith.addf %121, %124 : vector<8x128xf32>
    %126 = arith.mulf %3, %119 : vector<8x128xf32>
    %127 = arith.addf %125, %126 : vector<8x128xf32>
    %128 = arith.addf %127, %4 : vector<8x128xf32>
    %cst_61 = arith.constant 0.000000e+00 : f32
    %129 = vector.broadcast %cst_61 : f32 to vector<8x128xf32>
    %130 = arith.maximumf %128, %129 : vector<8x128xf32>
    %131 = arith.index_cast %c7_i32 : i32 to index
    %c0_62 = arith.constant 0 : index
    %c0_63 = arith.constant 0 : index
    %132 = vector.load %arg8[%131, %c0_62, %c0_63] : memref<8x8x128xf32, #tpu.memory_space<vmem>>, vector<1x8x128xf32>
    %133 = vector.shape_cast %132 : vector<1x8x128xf32> to vector<8x128xf32>
    %134 = vector.shape_cast %130 : vector<8x128xf32> to vector<1x8x128xf32>
    tpu.vector_store %arg8[%131, %c0_62, %c0_63], %134 {strides = array<i32>} : memref<8x8x128xf32, #tpu.memory_space<vmem>>, vector<1x8x128xf32>,
    %c8_i32 = arith.constant 8 : i32
    %c0_64 = arith.constant 0 : index
    %c0_65 = arith.constant 0 : index
    %135 = vector.load %arg9[%c0_64, %c0_65] : memref<8x128xf32, #tpu.memory_space<vmem>>, vector<8x128xf32>
    tpu.vector_store %arg9[%c0_64, %c0_65], %130 {strides = array<i32>} : memref<8x128xf32, #tpu.memory_space<vmem>>, vector<8x128xf32>,
    %c0_66 = arith.constant 0 : index
    %c0_67 = arith.constant 0 : index
    %c0_68 = arith.constant 0 : index
    %136 = vector.load %arg8[%c0_66, %c0_67, %c0_68] : memref<8x8x128xf32, #tpu.memory_space<vmem>>, vector<8x8x128xf32>
    %137 = vector.shape_cast %136 : vector<8x8x128xf32> to vector<64x128xf32>
    %c0_69 = arith.constant 0 : index
    %c0_70 = arith.constant 0 : index
    %138 = vector.load %arg5[%c0_69, %c0_70] : memref<128x128xf32, #tpu.memory_space<vmem>>, vector<128x128xf32>
    %cst_71 = arith.constant dense<0.000000e+00> : vector<64x128xf32>
    %139 = tpu.matmul %137, %138, %cst_71 {dimension_numbers = #tpu.dot_dimension_numbers<[1], [0], [0], [1], [0, 0, 1, 1], [], []>} : vector<64x128xf32>, vector<128x128xf32>, vector<64x128xf32> -> vector<64x128xf32>
    %c0_72 = arith.constant 0 : index
    %c0_73 = arith.constant 0 : index
    %140 = vector.load %arg6[%c0_72, %c0_73] : memref<1x128xf32, #tpu.memory_space<vmem>>, vector<1x128xf32>
    %141 = vector.broadcast %140 : vector<1x128xf32> to vector<64x128xf32>
    %142 = arith.addf %139, %141 : vector<64x128xf32>
    %143 = vector.shape_cast %142 : vector<64x128xf32> to vector<8x8x128xf32>
    %c0_74 = arith.constant 0 : index
    %c0_75 = arith.constant 0 : index
    %c0_76 = arith.constant 0 : index
    %144 = vector.load %arg7[%c0_74, %c0_75, %c0_76] : memref<8x8x128xf32, #tpu.memory_space<vmem>>, vector<8x8x128xf32>
    tpu.vector_store %arg7[%c0_74, %c0_75, %c0_76], %143 {strides = array<i32>} : memref<8x8x128xf32, #tpu.memory_space<vmem>>, vector<8x8x128xf32>,
    return
  }
  func.func @transform_0(%arg0: i32) -> (i32, i32, i32) {
    %c0_i32 = arith.constant 0 : i32
    %c0_i32_0 = arith.constant 0 : i32
    %c0_i32_1 = arith.constant 0 : i32
    return %arg0, %c0_i32, %c0_i32_0 : i32, i32, i32
  }
  func.func @transform_1(%arg0: i32) -> (i32, i32) {
    %c0_i32 = arith.constant 0 : i32
    %c0_i32_0 = arith.constant 0 : i32
    %c0_i32_1 = arith.constant 0 : i32
    return %c0_i32, %c0_i32_0 : i32, i32
  }
  func.func @transform_2(%arg0: i32) -> (i32, i32) {
    %c0_i32 = arith.constant 0 : i32
    %c0_i32_0 = arith.constant 0 : i32
    %c0_i32_1 = arith.constant 0 : i32
    return %c0_i32, %c0_i32_0 : i32, i32
  }
  func.func @transform_3(%arg0: i32) -> (i32, i32) {
    %c0_i32 = arith.constant 0 : i32
    %c0_i32_0 = arith.constant 0 : i32
    %c0_i32_1 = arith.constant 0 : i32
    return %c0_i32, %c0_i32_0 : i32, i32
  }
  func.func @transform_4(%arg0: i32) -> (i32, i32) {
    %c0_i32 = arith.constant 0 : i32
    %c0_i32_0 = arith.constant 0 : i32
    %c0_i32_1 = arith.constant 0 : i32
    return %c0_i32, %c0_i32_0 : i32, i32
  }
  func.func @transform_5(%arg0: i32) -> (i32, i32) {
    %c0_i32 = arith.constant 0 : i32
    %c0_i32_0 = arith.constant 0 : i32
    %c0_i32_1 = arith.constant 0 : i32
    return %c0_i32, %c0_i32_0 : i32, i32
  }
  func.func @transform_6(%arg0: i32) -> (i32, i32, i32) {
    %c0_i32 = arith.constant 0 : i32
    %c0_i32_0 = arith.constant 0 : i32
    %c0_i32_1 = arith.constant 0 : i32
    return %arg0, %c0_i32, %c0_i32_0 : i32, i32, i32
  }
  func.func @transform_7(%arg0: i32) -> (i32, i32, i32) {
    %c0_i32 = arith.constant 0 : i32
    %c0_i32_0 = arith.constant 0 : i32
    %c0_i32_1 = arith.constant 0 : i32
    return %arg0, %c0_i32, %c0_i32_0 : i32, i32, i32
  }
}

</mosaic_0001>

<bundles_post_ra>
// kernel: tpu_custom_call.1
= control target key start
LH: loop header
LB: loop body
LE: loop exit
PB: predicated region body
PF: predicated region fallthrough
CT: control target
= control target key end

     0   :  { %13 = vsyncpa [#allocation4], 0  ;;  %s3086_s0 = inlined_call_operand.hbm [shape: f32[16,8,128], index: 0, kind: input, shape index: {}]   ;;  %s3087_s1 = inlined_call_operand.hbm [shape: f32[8,128], index: 1, kind: input, shape index: {}]   ;;  %s3088_s2 = inlined_call_operand.hbm [shape: f32[8,128], index: 2, kind: input, shape index: {}]   ;;  %s3089_s3 = inlined_call_operand.hbm [shape: f32[128,128], index: 3, kind: input, shape index: {}]   ;;  %s3090_s4 = inlined_call_operand.hbm [shape: f32[128,128], index: 4, kind: input, shape index: {}]   ;;  %s3091_s5 = inlined_call_operand.vmem [shape: f32[1,128], index: 5, kind: input, shape index: {}]   ;;  %s3092_s6 = inlined_call_operand.hbm [shape: f32[16,8,128], index: 6, kind: output, shape index: {0}]   ;;  %s3093_s7 = inlined_call_operand.hbm [shape: f32[16,8,128], index: 7, kind: output, shape index: {1}]  }
   0x1   :  { %15 = vsyncpa [#allocation4 + $0x1], 0 }
   0x2   :  { %16 = vsyncpa [#allocation7], 0 }
   0x3   :  { %17 = vsyncpa [#allocation10], 0 }
   0x4   :  { %18 = vsyncpa [#allocation5], 0 }
   0x5   :  { %20 = vsyncpa [#allocation5 + $0x1], 0 }
   0x6   :  { %21 = vsyncpa [#allocation14], 0 }
   0x7   :  { %23 = vsyncpa [#allocation14 + $0x1], 0  ;;  %s2508_s24 = smov 0   ;;  %s2510_s25 = smov 0  }
   0x8   :  { %s2512_s26 = smov 0   ;;  %s2514_s27 = smov 0  }
   0x9 LB: > { %s2529_s28 = sadd.s32 4294967295, %s2451_s27   ;;  %s1350_s29 = sadd.s32 4294967294, %s2451_s27   ;;  %s2451_s27 = sphi %s2514_s27, %s3122_s27   ;;  %s2447_s26 = sphi %s2512_s26, %s3121_s26   ;;  %s2443_s25 = sphi %s2510_s25, %s3120_s25   ;;  %s2439_s24 = sphi %s2508_s24, %s3119_s24  }
   0xa   : > { %p49_p0 = scmp.ne.s32.totalorder %s2443_s25, %s2439_s24  ;;  %p3094_p1 = scmp.eq.s32.totalorder %s2529_s28, 0 }
   0xb   : > { %p184_p3 = scmp.eq.s32.totalorder %s1350_s29, 1  ;;  %p1351_p5 = scmp.ge.s32.totalorder %s2451_s27, 1 }
   0xc   : > { %p2538_p4 = por %p3094_p1, %p49_p0  ;;  %p217_p7 = scmp.lt.s32.totalorder %s2451_s27, 3 }
   0xd   : > { %p2543_p6 = por %p184_p3, %p49_p0  ;;  %s2453_s10 = smov [#allocation6]  }
   0xe   : > { %s3100_s30 = scalar_select %p2538_p4, 1, 0 }
   0xf   : > { %s3101_s8 = scalar_select %p2543_p6, 1, 0 }
  0x10   : > { %p2549_p9 = pnand %p1351_p5, %p217_p7  ;;  %s230_s11 = sshll.u32 %s2453_s10, 4  ;;  %s231_s11 = int_to_ptr.vmem [resolvable:$true] %s230_s11 }
  0x11   : > { %s2454_s12 = smov [#allocation9]   ;;  %s2455_s15 = smov [#allocation8]  }
  0x12   : > { %s3102_s9 = scalar_select %p2549_p9, 1, 0 }
  0x13   : > { %p2125_p11 = pneg %p2549_p9  ;;  %s251_s13 = sshll.u32 %s2454_s12, 4  ;;  %s2562_s13 = int_to_ptr.vmem [resolvable:$true] %s251_s13 }
  0x14   : > { %s2564_s16 = sshll.u32 %s2455_s15, 4  ;;  %s2203_s19 = scalar_lea.hbm %s3087_s1, 128  ;;  %s242_s16 = int_to_ptr.vmem [resolvable:$true] %s2564_s16 }
  0x15   : > { %p2558_p12 = pnand %p2125_p11, %p3094_p1  ;;  %p2204_p13 = scmp.ne.s32.totalorder %s3087_s1, %s2203_s19 }
  0x16   : > { %p2210_p7 = scmp.lt.u32.totalorder %s2203_s19, %s3087_s1 }
  0x17   : > { %p2574_p0 = pneg %p2558_p12 }
  0x19   : > { %p2206_p3 = pnand %p2574_p0, %p2204_p13 }
  0x1b   : > { %p2207_p5 = pneg %p2206_p3 }
  0x1d   : > { %p2212_p11 = pnand %p2210_p7, %p2207_p5 }
  0x1f   : > { %2215 = shalt.err (!%p2212_p11)
}
  0x20   : > { %s2216_s10 = scalar_lea.vmem %s231_s11, 128  ;;  %p2224_p2 = scmp.lt.s32.totalorder %s231_s11, %s231_s11 }
  0x21   : > { %p2217_p10 = scmp.ne.s32.totalorder %s231_s11, %s2216_s10  ;;  %p2225_p6 = scmp.lt.s32.totalorder %s2216_s10, %s2216_s10 }
  0x23   : > { %p2219_p8 = pnand %p2217_p10, %p2574_p0  ;;  %p2226_p4 = por %p2225_p6, %p2224_p2 }
  0x25   : > { %p2220_p1 = pneg %p2219_p8 }
  0x27   : > { %p2227_p9 = pnand %p2226_p4, %p2220_p1 }
  0x29   : > { %2230 = shalt.err (!%p2227_p9)
}
  0x2a   : > { %2128 = dma.hbm_to_vmem [thread:$0]  (!%p2558_p12), %s3087_s1, 128, %s231_s11, [#allocation7]  }
  0x2b   : > { %s2231_s19 = scalar_lea.hbm %s3089_s3, 2048 }
  0x2c   : > { %p2232_p8 = scmp.ne.s32.totalorder %s3089_s3, %s2231_s19  ;;  %p2238_p1 = scmp.lt.u32.totalorder %s2231_s19, %s3089_s3 }
  0x2e   : > { %p2234_p10 = pnand %p2232_p8, %p2574_p0 }
  0x30   : > { %p2235_p2 = pneg %p2234_p10 }
  0x32   : > { %p2240_p4 = pnand %p2238_p1, %p2235_p2 }
  0x34   : > { %2243 = shalt.err (!%p2240_p4)
}
  0x35   : > { %s2244_s11 = scalar_lea.vmem %s2562_s13, 2048  ;;  %p2252_p3 = scmp.lt.s32.totalorder %s2562_s13, %s2562_s13 }
  0x36   : > { %p2245_p6 = scmp.ne.s32.totalorder %s2562_s13, %s2244_s11  ;;  %p2253_p5 = scmp.lt.s32.totalorder %s2244_s11, %s2244_s11 }
  0x38   : > { %p2247_p9 = pnand %p2245_p6, %p2574_p0  ;;  %p2254_p7 = por %p2253_p5, %p2252_p3 }
  0x3a   : > { %p2248_p13 = pneg %p2247_p9 }
  0x3c   : > { %p2255_p11 = pnand %p2254_p7, %p2248_p13 }
  0x3e   : > { %2258 = shalt.err (!%p2255_p11)
}
  0x3f   : > { %s3097_s10 = smov 128   ;;  %s3099_s12 = smov 8  }
  0x40   : > { %2134 = dma.hbm_to_vmem [thread:$0]  (!%p2558_p12), %s3089_s3, 2048, %s2562_s13, [#allocation10], %s3097_s10, %s3097_s10, %s3099_s12  }
  0x41   : > { %s2259_s20 = scalar_lea.hbm %s3088_s2, 128 }
  0x42   : > { %p2260_p8 = scmp.ne.s32.totalorder %s3088_s2, %s2259_s20  ;;  %p2266_p1 = scmp.lt.u32.totalorder %s2259_s20, %s3088_s2 }
  0x44   : > { %p2262_p10 = pnand %p2260_p8, %p2574_p0 }
  0x46   : > { %p2263_p2 = pneg %p2262_p10 }
  0x48   : > { %p2268_p4 = pnand %p2266_p1, %p2263_p2 }
  0x4a   : > { %2271 = shalt.err (!%p2268_p4)
}
  0x4b   : > { %s2272_s15 = scalar_lea.vmem %s242_s16, 128  ;;  %p2280_p3 = scmp.lt.s32.totalorder %s242_s16, %s242_s16 }
  0x4c   : > { %p2273_p6 = scmp.ne.s32.totalorder %s242_s16, %s2272_s15  ;;  %p2281_p5 = scmp.lt.s32.totalorder %s2272_s15, %s2272_s15 }
  0x4e   : > { %p2275_p9 = pnand %p2273_p6, %p2574_p0  ;;  %p2282_p7 = por %p2281_p5, %p2280_p3 }
  0x50   : > { %p2276_p13 = pneg %p2275_p9 }
  0x52   : > { %p2283_p11 = pnand %p2282_p7, %p2276_p13 }
  0x54   : > { %2286 = shalt.err (!%p2283_p11)
}
  0x55   : > { %2131 = dma.hbm_to_vmem [thread:$0]  (!%p2558_p12), %s3088_s2, 128, %s242_s16, [#allocation7]  }
  0x56   : > { %s2458_s18 = smov [#allocation11]   ;;  %s2287_s23 = scalar_lea.hbm %s3090_s4, 2048 }
  0x57   : > { %s264_s19 = sshll.u32 %s2458_s18, 4  ;;  %p2288_p8 = scmp.ne.s32.totalorder %s3090_s4, %s2287_s23  ;;  %s265_s19 = int_to_ptr.vmem [resolvable:$true] %s264_s19 }
  0x58   : > { %p2294_p1 = scmp.lt.u32.totalorder %s2287_s23, %s3090_s4 }
  0x59   : > { %p2290_p10 = pnand %p2288_p8, %p2574_p0 }
  0x5b   : > { %p2291_p2 = pneg %p2290_p10 }
  0x5d   : > { %p2296_p4 = pnand %p2294_p1, %p2291_p2 }
  0x5f   : > { %2299 = shalt.err (!%p2296_p4)
}
  0x60   : > { %s2300_s16 = scalar_lea.vmem %s265_s19, 2048  ;;  %p2308_p3 = scmp.lt.s32.totalorder %s265_s19, %s265_s19 }
  0x61   : > { %p2301_p6 = scmp.ne.s32.totalorder %s265_s19, %s2300_s16  ;;  %p2309_p5 = scmp.lt.s32.totalorder %s2300_s16, %s2300_s16 }
  0x63   : > { %p2303_p9 = pnand %p2301_p6, %p2574_p0  ;;  %p2310_p7 = por %p2309_p5, %p2308_p3 }
  0x65   : > { %p2304_p13 = pneg %p2303_p9 }
  0x67   : > { %p2311_p11 = pnand %p2310_p7, %p2304_p13 }
  0x69   : > { %2314 = shalt.err (!%p2311_p11)
}
  0x6a   : > { %s3105_s13 = smov 128   ;;  %s2657_s22 = sadd.s32 1, %s2451_s27  }
  0x6b   : > { %2137 = dma.hbm_to_vmem [thread:$0]  (!%p2558_p12), %s3090_s4, 2048, %s265_s19, [#allocation10], %s3105_s13, %s3105_s13, %s3099_s12  }
  0x6c   : > { %s36_s14 = sadd.s32 1, %s2447_s26  ;;  %s33_s18 = ssub.s32 %s2451_s27, %s2657_s22 }
  0x6d   : > { %p43_p0 = scmp.ne.s32.totalorder %s2447_s26, %s2443_s25  ;;  %p34_p8 = scmp.eq.s32.totalorder %s33_s18, 0 }
  0x6e   : > { %p44_p10 = scmp.eq.s32.totalorder %s2451_s27, 0  ;;  %p3106_p2 = scmp.eq.s32.totalorder %s2529_s28, 1 }
  0x6f   : > { %p2153_p4 = scmp.lt.s32.totalorder %s2451_s27, 2  ;;  %s281_s23 = sand.u32 1, %s2447_s26  }
  0x70   : > { %p2667_p1 = por %p3106_p2, %p43_p0  ;;  %p45_p6 = por %p44_p10, %p43_p0 }
  0x71   : > { %s2673_s21 = scalar_select %p34_p8, %s2447_s26, %s36_s14  }
  0x72   : > { %s1357_s29 = sshll.u32 %s281_s23, 6  ;;  %s1392_s19 = sshll.u32 %s2451_s27, 10 }
  0x73   : > { %s2680_s16 = scalar_lea.hbm %s3086_s0, %s1392_s19  ;;  %s285_s10 = scalar_lea.vmem [#allocation3], %s1357_s29 }
  0x74   : > { %s292_s17 = sshll.u32 %s285_s10, 4  ;;  %p2684_p12 = pnand %p2153_p4, %p45_p6  ;;  %s2682_s17 = int_to_ptr.vmem [resolvable:$true] %s292_s17 }
  0x75   : > { %s2688_s18 = scalar_lea.sflag [#allocation4], %s281_s23  ;;  %s2315_s12 = scalar_lea.hbm %s2680_s16, 1024 }
  0x76   : > { %p2316_p9 = scmp.ne.s32.totalorder %s2680_s16, %s2315_s12  ;;  %p2317_p13 = pneg %p2684_p12 }
  0x77   : > { %s2320_s11 = scalar_lea.hbm %s3086_s0, 2048  ;;  %p2321_p7 = scmp.lt.u32.totalorder %s2680_s16, %s3086_s0 }
  0x78   : > { %p2318_p3 = pnand %p2317_p13, %p2316_p9  ;;  %p2322_p11 = scmp.lt.u32.totalorder %s2320_s11, %s2315_s12 }
  0x79   : > { %p2324_p8 = scmp.lt.u32.totalorder %s2315_s12, %s2680_s16 }
  0x7a   : > { %p2319_p5 = pneg %p2318_p3  ;;  %p2323_p0 = por %p2322_p11, %p2321_p7 }
  0x7c   : > { %p2325_p10 = por %p2324_p8, %p2323_p0 }
  0x7e   : > { %p2326_p2 = pnand %p2325_p10, %p2319_p5 }
  0x80   : > { %2329 = shalt.err (!%p2326_p2)
}
  0x81   : > { %s2330_s23 = scalar_lea.vmem %s2682_s17, 1024  ;;  %s2459_s29 = smov [#allocation3]  }
  0x82   : > { %p2331_p4 = scmp.ne.s32.totalorder %s2682_s17, %s2330_s23  ;;  %s2335_s19 = sshll.u32 %s2459_s29, 4  ;;  %s2336_s19 = int_to_ptr.vmem [resolvable:$false] %s2335_s19 }
  0x83   : > { %s2337_s15 = scalar_lea.vmem %s2336_s19, 2048  ;;  %p2338_p3 = scmp.lt.s32.totalorder %s2682_s17, %s2336_s19 }
  0x84   : > { %p2333_p6 = pnand %p2331_p4, %p2317_p13  ;;  %p2339_p7 = scmp.lt.s32.totalorder %s2337_s15, %s2330_s23 }
  0x86   : > { %p2334_p9 = pneg %p2333_p6  ;;  %p2340_p11 = por %p2339_p7, %p2338_p3 }
  0x88   : > { %p2341_p0 = pnand %p2340_p11, %p2334_p9 }
  0x8a   : > { %2344 = shalt.err (!%p2341_p0)
}
  0x8b   : > { %s3109_s12 = smov 8   ;;  %p3110_p13 = scmp.ne.s32.totalorder %s3102_s9, 0 }
  0x8c   : > { %2141 = dma.hbm_to_vmem [thread:$0]  (!%p2684_p12), %s2680_s16, 1024, %s2682_s17, %s2688_s18, %s3105_s13, %s3105_s13, %s3109_s12  }
  0x8d   : > { %304 = sbr.rel (%p3110_p13) target bundleno = 2189 (0x88d), region = 44  ;;  %s2722_s11 = sand.u32 (!%p3110_p13), 1, %s2443_s25  }
  0x8e   : > { %s1361_s10 = sshll.u32 (!%p3110_p13), %s2722_s11, 6  ;;  %s307_s23 = scalar_lea.sflag (!%p3110_p13), [#allocation4], %s2722_s11 }
  0x8f   : > { %s2726_s29 = scalar_lea.vmem (!%p3110_p13), [#allocation3], %s1361_s10  ;;  %p3111_p5 = scmp.ne.s32.totalorder (!%p3110_p13), %s3100_s30, 0 }
  0x94   : > { %2418 = dma.done.wait (%p3111_p5), %s307_s23, 1024  }
  0x95   : > { %2420 = vsyncadd (%p3111_p5), %s307_s23, 4294966272  ;;  %p3112_p12 = scmp.eq.s32.totalorder %s2529_s28, 0 }
  0x97   : > { %2422 = dma.done.wait (%p3112_p12), [#allocation7], 256   ;;  %p3113_p8 = pmov %p3112_p12 }
  0x99   : > { %2424 = vsyncadd (%p3113_p8), [#allocation7], 4294967040  ;;  %p3114_p10 = pmov %p3113_p8 }
  0x9a   : > { %p3115_p2 = pmov %p3113_p8 }
  0x9b   : > { %2426 = dma.done.wait (%p3114_p10), [#allocation10], 4096  }
  0x9c   : > { %2428 = vsyncadd (%p3115_p2), [#allocation10], 4294963200  ;;  %s2740_s9 = scalar_lea.vmem [#allocation12], %s1361_s10  ;;  %s2742_s13 = scalar_lea.vmem [#allocation13], %s1361_s10 }
  0x9d   : > { %p3116_p4 = scmp.ne.s32.totalorder %s2529_s28, 0 }
  0x9e   : > { %v2460_v0 = vmov (!%p3116_p4), 0.0  }
  0x9f   : > { %368 = sbr.rel (%p3116_p4) target bundleno = 166 (0xa6), region = 68  ;;  %369 = vst [vmem:[#allocation2] sm:$0xff] (!%p3116_p4), %v2460_v0 }
  0xa6 PF: > { %v372_v1 = vld [vmem:[#allocation9] sm:$0xff]  ;;  %v373_v2 = vld [vmem:[#allocation9 + $0x8] sm:$0xff]  ;;  %v374_v3 = vld [vmem:[#allocation9 + $0x10] sm:$0xff]  ;;  %v2461_v4 = vmov 0.0|0.0   ;;  %vm2462_vm0 = vmmov 0   ;;  %v2463_v7 = vmov 0.0  }
  0xa7   : > { %1879 = vmatprep.subr.bf16.mxu1 %v2461_v4  ;;  %v2747_v5 = vpack.c.bf16 %v373_v2, %v372_v1  ;;  %v375_v6 = vld [vmem:[#allocation9 + $0x18] sm:$0xff]  ;;  %1587 = vmatprep.mubr.msk.f32.mxu1 %vm2462_vm0, %v2463_v7  ;;  %v376_v9 = vld [vmem:[#allocation9 + $0x20] sm:$0xff]  ;;  %v377_v10 = vld [vmem:[#allocation9 + $0x28] sm:$0xff]  ;;  %s1393_s17 = sshll.u32 %s2529_s28, 10  ;;  %s1207_s15 = sshll.u32 %s2742_s13, 4  ;;  %s2998_s15 = int_to_ptr.vmem [resolvable:$true] %s1207_s15 }
  0xa8   : > { %1927 = vmatprep.subr.bf16.mxu0 %v2461_v4  ;;  %1657 = vmatprep.mubr.msk.f32.mxu0 %vm2462_vm0, %v2463_v7  ;;  %v2755_v8 = vpack.c.bf16 %v375_v6, %v374_v3  ;;  %v2761_v11 = vpack.c.bf16 %v377_v10, %v376_v9  ;;  %v378_v12 = vld [vmem:[#allocation9 + $0x30] sm:$0xff]  ;;  %v379_v13 = vld [vmem:[#allocation9 + $0x38] sm:$0xff]  ;;  %v380_v15 = vld [vmem:[#allocation9 + $0x40] sm:$0xff]  ;;  %s2995_s19 = scalar_lea.hbm %s3093_s7, %s1393_s17  ;;  %s1178_s12 = scalar_lea.sflag [#allocation14], %s2722_s11 }
  0xa9   : > { %1881 = vmatpush3.bf16.msra.mxu1 %v2747_v5  ;;  %1929 = vmatpush3.bf16.msra.mxu0 %v2747_v5  ;;  %v2767_v14 = vpack.c.bf16 %v379_v13, %v378_v12  ;;  %v381_v16 = vld [vmem:[#allocation9 + $0x48] sm:$0xff]  ;;  %v382_v18 = vld [vmem:[#allocation9 + $0x50] sm:$0xff]  ;;  %v383_v19 = vld [vmem:[#allocation9 + $0x58] sm:$0xff]  ;;  %s2345_s10 = scalar_lea.vmem %s2998_s15, 1024  ;;  %s2464_s23 = smov [#allocation13]  }
  0xaa   : > { %1882 = vmatprep.subr.bf16.mxu1 %v2461_v4  ;;  %1930 = vmatprep.subr.bf16.mxu0 %v2461_v4  ;;  %v2773_v17 = vpack.c.bf16 %v381_v16, %v380_v15  ;;  %v2779_v20 = vpack.c.bf16 %v383_v19, %v382_v18  ;;  %v384_v21 = vld [vmem:[#allocation9 + $0x60] sm:$0xff]  ;;  %v385_v22 = vld [vmem:[#allocation9 + $0x68] sm:$0xff]  ;;  %v386_v24 = vld [vmem:[#allocation9 + $0x70] sm:$0xff]  ;;  %p2346_p6 = scmp.ne.s32.totalorder %s2998_s15, %s2345_s10 }
  0xab   : > { %v2785_v23 = vpack.c.bf16 %v385_v22, %v384_v21  ;;  %v387_v25 = vld [vmem:[#allocation9 + $0x78] sm:$0xff]  ;;  %v388_v27 = vld [vmem:[#allocation2] sm:$0xff]  ;;  %v460_v29 = vld [vmem:[%s2726_s29] sm:$0xff] }
  0xac   : > { %v2791_v26 = vpack.c.bf16 %v387_v25, %v386_v24  ;;  %v459_v28 = vmul.f32 0.5, %v388_v27  ;;  %v2819_v30 = vld [vmem:[#allocation6] sm:$0xff]  ;;  %v2822_v35 = vld [vmem:[#allocation8] sm:$0xff]  ;;  %v1371_v49 = vld [vmem:[%s2726_s29 + $0x10] sm:$0xff]  ;;  %p2347_p9 = pnand %p2346_p6, %p2667_p1 }
  0xad   : > { %1884 = vmatpush3.bf16.msra.mxu1 %v2755_v8  ;;  %1932 = vmatpush3.bf16.msra.mxu0 %v2755_v8  ;;  %v1369_v40 = vld [vmem:[%s2726_s29 + $0x8] sm:$0xff]  ;;  %v1373_v58 = vld [vmem:[%s2726_s29 + $0x18] sm:$0xff]  ;;  %v1375_v3 = vld [vmem:[%s2726_s29 + $0x20] sm:$0xff] }
  0xae   : > { %1885 = vmatprep.subr.bf16.mxu1 %v2461_v4  ;;  %1933 = vmatprep.subr.bf16.mxu0 %v2461_v4  ;;  %v461_v31 = vadd.f32 %v460_v29, %v459_v28  ;;  %v1038_v22 = vld [vmem:[#allocation11 + $0x10] sm:$0xff]  ;;  %p2348_p3 = pneg %p2347_p9 }
  0xaf   : > { %v1042_v29 = vld [vmem:[#allocation11 + $0x30] sm:$0xff] }
  0xb1   : > { %1887 = vmatpush3.bf16.msra.mxu1 %v2761_v11  ;;  %1935 = vmatpush3.bf16.msra.mxu0 %v2761_v11 }
  0xb2   : > { %1888 = vmatprep.subr.bf16.mxu1 %v2461_v4  ;;  %1936 = vmatprep.subr.bf16.mxu0 %v2461_v4 }
  0xb5   : > { %1890 = vmatpush3.bf16.msra.mxu1 %v2767_v14  ;;  %1938 = vmatpush3.bf16.msra.mxu0 %v2767_v14 }
  0xb6   : > { %1891 = vmatprep.subr.bf16.mxu1 %v2461_v4  ;;  %1939 = vmatprep.subr.bf16.mxu0 %v2461_v4 }
  0xb9   : > { %1893 = vmatpush3.bf16.msra.mxu1 %v2773_v17  ;;  %1941 = vmatpush3.bf16.msra.mxu0 %v2773_v17 }
  0xba   : > { %1894 = vmatprep.subr.bf16.mxu1 %v2461_v4  ;;  %1942 = vmatprep.subr.bf16.mxu0 %v2461_v4 }
  0xbd   : > { %1896 = vmatpush3.bf16.msra.mxu1 %v2779_v20  ;;  %1944 = vmatpush3.bf16.msra.mxu0 %v2779_v20 }
  0xbe   : > { %1897 = vmatprep.subr.bf16.mxu1 %v2461_v4  ;;  %1945 = vmatprep.subr.bf16.mxu0 %v2461_v4 }
  0xc1   : > { %1899 = vmatpush3.bf16.msra.mxu1 %v2785_v23  ;;  %1947 = vmatpush3.bf16.msra.mxu0 %v2785_v23 }
  0xc2   : > { %1900 = vmatprep.subr.bf16.mxu1 %v2461_v4  ;;  %1948 = vmatprep.subr.bf16.mxu0 %v2461_v4 }
  0xc5   : > { %1902 = vmatpush3.bf16.msra.mxu1 %v2791_v26  ;;  %1950 = vmatpush3.bf16.msra.mxu0 %v2791_v26 }
  0xc6   : > { %1903 = vmatprep.subr.bf16.mxu1 %v2461_v4  ;;  %1975 = vmatprep.subr.bf16.mxu0 %v2461_v4 }
  0xc8   : > { %1588 = vmatmul.mubr.f32.vlgmr.msra.gmra.mrb[0].mxu1 %v388_v27  ;;  %v1041_v27 = vld [vmem:[#allocation11 + $0x28] sm:$0xff] }
  0xc9   : > { %1905 = vmatpush3.bf16.msra.mxu1 %v2747_v5  ;;  %1622 = vmatprep.mubr.msk.f32.mxu1 %vm2462_vm0, %v2463_v7 }
  0xca   : > { %1906 = vmatprep.subr.bf16.mxu1 %v2461_v4 }
  0xcd   : > { %1908 = vmatpush3.bf16.msra.mxu1 %v2755_v8 }
  0xce   : > { %1909 = vmatprep.subr.bf16.mxu1 %v2461_v4 }
  0xd1   : > { %1911 = vmatpush3.bf16.msra.mxu1 %v2761_v11 }
  0xd2   : > { %1912 = vmatprep.subr.bf16.mxu1 %v2461_v4 }
  0xd5   : > { %1914 = vmatpush3.bf16.msra.mxu1 %v2767_v14 }
  0xd6   : > { %1915 = vmatprep.subr.bf16.mxu1 %v2461_v4 }
  0xd9   : > { %1917 = vmatpush3.bf16.msra.mxu1 %v2773_v17 }
  0xda   : > { %1918 = vmatprep.subr.bf16.mxu1 %v2461_v4 }
  0xdd   : > { %1920 = vmatpush3.bf16.msra.mxu1 %v2779_v20 }
  0xde   : > { %1921 = vmatprep.subr.bf16.mxu1 %v2461_v4 }
  0xe1   : > { %1923 = vmatpush3.bf16.msra.mxu1 %v2785_v23 }
  0xe2   : > { %1924 = vmatprep.subr.bf16.mxu1 %v2461_v4 }
  0xe5   : > { %1926 = vmatpush3.bf16.msra.mxu1 %v2791_v26 }
  0xe6   : > { %1951 = vmatprep.subr.bf16.mxu1 %v2461_v4 }
 0x19b   : > { %v455_v32 = vpop.f32.mrb[0].mxu1 }
 0x19c   : > { %v462_v33 = vmul.f32 %v455_v32, %v2819_v30  ;;  %v1589_v34 = vpop.f32.mrb[1].mxu1 }
 0x19d   : > { %v1045_v34 = vld [vmem:[#allocation11 + $0x48] sm:$0xff] }
 0x19e   : > { %v463_v36 = vadd.f32 %v462_v33, %v461_v31  ;;  %v1043_v31 = vld [vmem:[#allocation11 + $0x38] sm:$0xff]  ;;  %v1044_v33 = vld [vmem:[#allocation11 + $0x40] sm:$0xff] }
 0x19f   : > { %v2083_v32 = vpack.c.bf16 %v1043_v31, %v1042_v29 }
 0x1a0   : > { %v464_v37 = vadd.f32 %v463_v36, %v2822_v35  ;;  %v2087_v36 = vpack.c.bf16 %v1045_v34, %v1044_v33 }
 0x1a2   : > { %v2825_v38 = vmax.f32 %v464_v37, 0.0  ;;  %v1046_v37 = vld [vmem:[#allocation11 + $0x50] sm:$0xff] }
 0x1a4   : > { %466 = vst [vmem:[%s2742_s13] sm:$0xff] %v2825_v38  ;;  %1623 = vmatmul.mubr.f32.vlgmr.msra.gmra.mrb[2].mxu1 %v2825_v38  ;;  %v537_v39 = vmul.f32 0.5, %v2825_v38 }
 0x1a5   : > { %1953 = vmatpush3.bf16.msra.mxu1 %v2747_v5  ;;  %1692 = vmatprep.mubr.msk.f32.mxu1 %vm2462_vm0, %v2463_v7 }
 0x1a6   : > { %1954 = vmatprep.subr.bf16.mxu1 %v2461_v4  ;;  %v540_v42 = vadd.f32 %v1369_v40, %v537_v39  ;;  %v1047_v39 = vld [vmem:[#allocation11 + $0x58] sm:$0xff] }
 0x1a7   : > { %v2091_v40 = vpack.c.bf16 %v1047_v39, %v1046_v37 }
 0x1a9   : > { %1956 = vmatpush3.bf16.msra.mxu1 %v2755_v8 }
 0x1aa   : > { %1957 = vmatprep.subr.bf16.mxu1 %v2461_v4 }
 0x1ad   : > { %1959 = vmatpush3.bf16.msra.mxu1 %v2761_v11 }
 0x1ae   : > { %1960 = vmatprep.subr.bf16.mxu1 %v2461_v4 }
 0x1b1   : > { %1962 = vmatpush3.bf16.msra.mxu1 %v2767_v14 }
 0x1b2   : > { %1963 = vmatprep.subr.bf16.mxu1 %v2461_v4 }
 0x1b5   : > { %1965 = vmatpush3.bf16.msra.mxu1 %v2773_v17 }
 0x1b6   : > { %1966 = vmatprep.subr.bf16.mxu1 %v2461_v4 }
 0x1b9   : > { %1968 = vmatpush3.bf16.msra.mxu1 %v2779_v20 }
 0x1ba   : > { %1969 = vmatprep.subr.bf16.mxu1 %v2461_v4 }
 0x1bd   : > { %1971 = vmatpush3.bf16.msra.mxu1 %v2785_v23 }
 0x1be   : > { %1972 = vmatprep.subr.bf16.mxu1 %v2461_v4 }
 0x1c1   : > { %1974 = vmatpush3.bf16.msra.mxu1 %v2791_v26 }
 0x1c2   : > { %1999 = vmatprep.subr.bf16.mxu1 %v2461_v4 }
 0x277   : > { %v533_v41 = vpop.f32.mrb[2].mxu1 }
 0x278   : > { %v541_v43 = vmul.f32 %v533_v41, %v2819_v30  ;;  %v1624_v44 = vpop.f32.mrb[3].mxu1  ;;  %v1048_v41 = vld [vmem:[#allocation11 + $0x60] sm:$0xff] }
 0x279   : > { %v1051_v44 = vld [vmem:[#allocation11 + $0x78] sm:$0xff] }
 0x27a   : > { %v542_v45 = vadd.f32 %v541_v43, %v540_v42  ;;  %v1049_v42 = vld [vmem:[#allocation11 + $0x68] sm:$0xff]  ;;  %v1050_v43 = vld [vmem:[#allocation11 + $0x70] sm:$0xff] }
 0x27c   : > { %v543_v46 = vadd.f32 %v542_v45, %v2822_v35  ;;  %v2099_v45 = vpack.c.bf16 %v1051_v44, %v1050_v43 }
 0x27e   : > { %v2852_v47 = vmax.f32 %v543_v46, 0.0 }
 0x280   : > { %1370 = vst [vmem:[%s2742_s13 + $0x8] sm:$0xff] %v2852_v47  ;;  %1658 = vmatmul.mubr.f32.vlgmr.msra.gmra.mrb[0].mxu0 %v2852_v47  ;;  %v617_v48 = vmul.f32 0.5, %v2852_v47 }
 0x281   : > { %1977 = vmatpush3.bf16.msra.mxu0 %v2747_v5  ;;  %1727 = vmatprep.mubr.msk.f32.mxu0 %vm2462_vm0, %v2463_v7 }
 0x282   : > { %1978 = vmatprep.subr.bf16.mxu0 %v2461_v4  ;;  %v620_v51 = vadd.f32 %v1371_v49, %v617_v48  ;;  %v1379_v48 = vld [vmem:[%s2726_s29 + $0x30] sm:$0xff] }
 0x285   : > { %1980 = vmatpush3.bf16.msra.mxu0 %v2755_v8 }
 0x286   : > { %1981 = vmatprep.subr.bf16.mxu0 %v2461_v4 }
 0x289   : > { %1983 = vmatpush3.bf16.msra.mxu0 %v2761_v11 }
 0x28a   : > { %1984 = vmatprep.subr.bf16.mxu0 %v2461_v4 }
 0x28d   : > { %1986 = vmatpush3.bf16.msra.mxu0 %v2767_v14 }
 0x28e   : > { %1987 = vmatprep.subr.bf16.mxu0 %v2461_v4 }
 0x291   : > { %1989 = vmatpush3.bf16.msra.mxu0 %v2773_v17 }
 0x292   : > { %1990 = vmatprep.subr.bf16.mxu0 %v2461_v4 }
 0x295   : > { %1992 = vmatpush3.bf16.msra.mxu0 %v2779_v20 }
 0x296   : > { %1993 = vmatprep.subr.bf16.mxu0 %v2461_v4 }
 0x299   : > { %1995 = vmatpush3.bf16.msra.mxu0 %v2785_v23 }
 0x29a   : > { %1996 = vmatprep.subr.bf16.mxu0 %v2461_v4 }
 0x29d   : > { %1998 = vmatpush3.bf16.msra.mxu0 %v2791_v26 }
 0x29e   : > { %2023 = vmatprep.subr.bf16.mxu0 %v2461_v4 }
 0x353   : > { %v613_v50 = vpop.f32.mrb[0].mxu0 }
 0x354   : > { %v621_v52 = vmul.f32 %v613_v50, %v2819_v30  ;;  %v1659_v53 = vpop.f32.mrb[1].mxu0 }
 0x356   : > { %v622_v54 = vadd.f32 %v621_v52, %v620_v51 }
 0x358   : > { %v623_v55 = vadd.f32 %v622_v54, %v2822_v35 }
 0x35a   : > { %v2879_v56 = vmax.f32 %v623_v55, 0.0  ;;  %v2971_v55 = vld [vmem:[%s3091_s5] ss:$0 sm:$0xff] }
 0x35c   : > { %1372 = vst [vmem:[%s2742_s13 + $0x10] sm:$0xff] %v2879_v56  ;;  %1693 = vmatmul.mubr.f32.vlgmr.msra.gmra.mrb[4].mxu1 %v2879_v56  ;;  %v697_v57 = vmul.f32 0.5, %v2879_v56 }
 0x35d   : > { %2001 = vmatpush3.bf16.msra.mxu1 %v2747_v5  ;;  %1762 = vmatprep.mubr.msk.f32.mxu1 %vm2462_vm0, %v2463_v7 }
 0x35e   : > { %2002 = vmatprep.subr.bf16.mxu1 %v2461_v4  ;;  %v700_v60 = vadd.f32 %v1373_v58, %v697_v57 }
 0x361   : > { %2004 = vmatpush3.bf16.msra.mxu1 %v2755_v8 }
 0x362   : > { %2005 = vmatprep.subr.bf16.mxu1 %v2461_v4 }
 0x365   : > { %2007 = vmatpush3.bf16.msra.mxu1 %v2761_v11 }
 0x366   : > { %2008 = vmatprep.subr.bf16.mxu1 %v2461_v4 }
 0x369   : > { %2010 = vmatpush3.bf16.msra.mxu1 %v2767_v14 }
 0x36a   : > { %2011 = vmatprep.subr.bf16.mxu1 %v2461_v4 }
 0x36d   : > { %2013 = vmatpush3.bf16.msra.mxu1 %v2773_v17 }
 0x36e   : > { %2014 = vmatprep.subr.bf16.mxu1 %v2461_v4 }
 0x371   : > { %2016 = vmatpush3.bf16.msra.mxu1 %v2779_v20 }
 0x372   : > { %2017 = vmatprep.subr.bf16.mxu1 %v2461_v4 }
 0x375   : > { %2019 = vmatpush3.bf16.msra.mxu1 %v2785_v23 }
 0x376   : > { %2020 = vmatprep.subr.bf16.mxu1 %v2461_v4 }
 0x379   : > { %2022 = vmatpush3.bf16.msra.mxu1 %v2791_v26 }
 0x37a   : > { %2047 = vmatprep.subr.bf16.mxu1 %v2461_v4 }
 0x42f   : > { %v693_v59 = vpop.f32.mrb[4].mxu1 }
 0x430   : > { %v701_v61 = vmul.f32 %v693_v59, %v2819_v30  ;;  %v1694_v62 = vpop.f32.mrb[5].mxu1 }
 0x432   : > { %v702_v63 = vadd.f32 %v701_v61, %v700_v60 }
 0x434   : > { %v703_v0 = vadd.f32 %v702_v63, %v2822_v35 }
 0x436   : > { %v2906_v1 = vmax.f32 %v703_v0, 0.0 }
 0x438   : > { %1374 = vst [vmem:[%s2742_s13 + $0x18] sm:$0xff] %v2906_v1  ;;  %1728 = vmatmul.mubr.f32.vlgmr.msra.gmra.mrb[2].mxu0 %v2906_v1  ;;  %v777_v2 = vmul.f32 0.5, %v2906_v1 }
 0x439   : > { %2025 = vmatpush3.bf16.msra.mxu0 %v2747_v5  ;;  %1797 = vmatprep.mubr.msk.f32.mxu0 %vm2462_vm0, %v2463_v7 }
 0x43a   : > { %2026 = vmatprep.subr.bf16.mxu0 %v2461_v4  ;;  %v780_v9 = vadd.f32 %v1375_v3, %v777_v2 }
 0x43d   : > { %2028 = vmatpush3.bf16.msra.mxu0 %v2755_v8 }
 0x43e   : > { %2029 = vmatprep.subr.bf16.mxu0 %v2461_v4 }
 0x441   : > { %2031 = vmatpush3.bf16.msra.mxu0 %v2761_v11 }
 0x442   : > { %2032 = vmatprep.subr.bf16.mxu0 %v2461_v4 }
 0x445   : > { %2034 = vmatpush3.bf16.msra.mxu0 %v2767_v14 }
 0x446   : > { %2035 = vmatprep.subr.bf16.mxu0 %v2461_v4 }
 0x449   : > { %2037 = vmatpush3.bf16.msra.mxu0 %v2773_v17 }
 0x44a   : > { %2038 = vmatprep.subr.bf16.mxu0 %v2461_v4 }
 0x44d   : > { %2040 = vmatpush3.bf16.msra.mxu0 %v2779_v20 }
 0x44e   : > { %2041 = vmatprep.subr.bf16.mxu0 %v2461_v4 }
 0x451   : > { %2043 = vmatpush3.bf16.msra.mxu0 %v2785_v23 }
 0x452   : > { %2044 = vmatprep.subr.bf16.mxu0 %v2461_v4 }
 0x455   : > { %2046 = vmatpush3.bf16.msra.mxu0 %v2791_v26 }
 0x50b   : > { %v773_v6 = vpop.f32.mrb[2].mxu0 }
 0x50c   : > { %v781_v10 = vmul.f32 %v773_v6, %v2819_v30  ;;  %v1729_v12 = vpop.f32.mrb[3].mxu0 }
 0x50e   : > { %v782_v13 = vadd.f32 %v781_v10, %v780_v9  ;;  %v1381_v9 = vld [vmem:[%s2726_s29 + $0x38] sm:$0xff] }
 0x510   : > { %v783_v15 = vadd.f32 %v782_v13, %v2822_v35 }
 0x512   : > { %v2932_v16 = vmax.f32 %v783_v15, 0.0 }
 0x514   : > { %1376 = vst [vmem:[%s2742_s13 + $0x20] sm:$0xff] %v2932_v16  ;;  %1763 = vmatmul.mubr.f32.vlgmr.msra.gmra.mrb[6].mxu1 %v2932_v16 }
 0x515   : > { %2049 = vmatpush3.bf16.msra.mxu1 %v2747_v5  ;;  %1832 = vmatprep.mubr.msk.f32.mxu1 %vm2462_vm0, %v2463_v7  ;;  %v1036_v5 = vld [vmem:[#allocation11] sm:$0xff]  ;;  %v1037_v7 = vld [vmem:[#allocation11 + $0x8] sm:$0xff] }
 0x516   : > { %2050 = vmatprep.subr.bf16.mxu1 %v2461_v4 }
 0x519   : > { %2052 = vmatpush3.bf16.msra.mxu1 %v2755_v8  ;;  %v2071_v8 = vpack.c.bf16 %v1037_v7, %v1036_v5 }
 0x51a   : > { %2053 = vmatprep.subr.bf16.mxu1 %v2461_v4 }
 0x51b   : > { %2072 = vmatprep.subr.bf16.mxu0 %v2071_v8 }
 0x51d   : > { %2055 = vmatpush3.bf16.msra.mxu1 %v2761_v11  ;;  %v857_v11 = vmul.f32 0.5, %v2932_v16 }
 0x51e   : > { %2056 = vmatprep.subr.bf16.mxu1 %v2461_v4 }
 0x521   : > { %2058 = vmatpush3.bf16.msra.mxu1 %v2767_v14  ;;  %v1377_v14 = vld [vmem:[%s2726_s29 + $0x28] sm:$0xff]  ;;  %s2349_s29 = sshll.u32 %s2464_s23, 4  ;;  %s2350_s29 = int_to_ptr.vmem [resolvable:$false] %s2349_s29 }
 0x522   : > { %2059 = vmatprep.subr.bf16.mxu1 %v2461_v4  ;;  %v860_v18 = vadd.f32 %v1377_v14, %v857_v11  ;;  %s2351_s30 = scalar_lea.vmem %s2350_s29, 2048  ;;  %p2352_p7 = scmp.lt.s32.totalorder %s2998_s15, %s2350_s29 }
 0x523   : > { %p2353_p11 = scmp.lt.s32.totalorder %s2351_s30, %s2345_s10 }
 0x525   : > { %2061 = vmatpush3.bf16.msra.mxu1 %v2773_v17  ;;  %p2354_p0 = por %p2353_p11, %p2352_p7 }
 0x526   : > { %2062 = vmatprep.subr.bf16.mxu1 %v2461_v4 }
 0x527   : > { %p2355_p13 = pnand %p2354_p0, %p2348_p3 }
 0x529   : > { %2064 = vmatpush3.bf16.msra.mxu1 %v2779_v20 }
 0x52a   : > { %2065 = vmatprep.subr.bf16.mxu1 %v2461_v4 }
 0x52d   : > { %2067 = vmatpush3.bf16.msra.mxu1 %v2785_v23  ;;  %v1039_v23 = vld [vmem:[#allocation11 + $0x18] sm:$0xff] }
 0x52e   : > { %2068 = vmatprep.subr.bf16.mxu1 %v2461_v4  ;;  %v2075_v25 = vpack.c.bf16 %v1039_v23, %v1038_v22 }
 0x531   : > { %2070 = vmatpush3.bf16.msra.mxu1 %v2791_v26  ;;  %v1040_v26 = vld [vmem:[#allocation11 + $0x20] sm:$0xff] }
 0x532   : > { %v2079_v28 = vpack.c.bf16 %v1041_v27, %v1040_v26 }
 0x5e7   : > { %v853_v17 = vpop.f32.mrb[6].mxu1 }
 0x5e8   : > { %v861_v19 = vmul.f32 %v853_v17, %v2819_v30  ;;  %v1764_v20 = vpop.f32.mrb[7].mxu1 }
 0x5ea   : > { %v862_v21 = vadd.f32 %v861_v19, %v860_v18 }
 0x5ec   : > { %v863_v4 = vadd.f32 %v862_v21, %v2822_v35 }
 0x5ee   : > { %v864_v24 = vmax.f32 %v863_v4, 0.0 }
 0x5f0   : > { %1378 = vst [vmem:[%s2742_s13 + $0x28] sm:$0xff] %v864_v24  ;;  %1798 = vmatmul.mubr.f32.vlgmr.msra.gmra.mrb[4].mxu0 %v864_v24  ;;  %v937_v46 = vmul.f32 0.5, %v864_v24 }
 0x5f1   : > { %2074 = vmatpush3.bf16.msra.mxu0 %v2071_v8  ;;  %1867 = vmatprep.mubr.f32.mxu0 %v2825_v38  ;;  %v2095_v38 = vpack.c.bf16 %v1049_v42, %v1048_v41 }
 0x5f2   : > { %2076 = vmatprep.subr.bf16.mxu0 %v2075_v25  ;;  %v940_v50 = vadd.f32 %v1379_v48, %v937_v46 }
 0x5f5   : > { %2078 = vmatpush3.bf16.msra.mxu0 %v2075_v25 }
 0x5f6   : > { %2080 = vmatprep.subr.bf16.mxu0 %v2079_v28 }
 0x5f9   : > { %2082 = vmatpush3.bf16.msra.mxu0 %v2079_v28 }
 0x5fa   : > { %2084 = vmatprep.subr.bf16.mxu0 %v2083_v32 }
 0x5fd   : > { %2086 = vmatpush3.bf16.msra.mxu0 %v2083_v32 }
 0x5fe   : > { %2088 = vmatprep.subr.bf16.mxu0 %v2087_v36 }
 0x601   : > { %2090 = vmatpush3.bf16.msra.mxu0 %v2087_v36 }
 0x602   : > { %2092 = vmatprep.subr.bf16.mxu0 %v2091_v40 }
 0x605   : > { %2094 = vmatpush3.bf16.msra.mxu0 %v2091_v40 }
 0x606   : > { %2096 = vmatprep.subr.bf16.mxu0 %v2095_v38 }
 0x609   : > { %2098 = vmatpush3.bf16.msra.mxu0 %v2095_v38 }
 0x60a   : > { %2100 = vmatprep.subr.bf16.mxu0 %v2099_v45 }
 0x60d   : > { %2102 = vmatpush3.bf16.msra.mxu0 %v2099_v45 }
 0x610   : > { %1868 = vmatmul.mubr.f32.vlgmr.msra.gmra.mrb[6].mxu0 %v2852_v47 }
 0x611   : > { %1870 = vmatprep.mubr.f32.mxu0 %v2879_v56 }
 0x614   : > { %1871 = vmatmul.mubr.f32.gmra.mrb[8].mxu0 %v2906_v1 }
 0x615   : > { %1873 = vmatprep.mubr.f32.mxu0 %v2932_v16 }
 0x618   : > { %1874 = vmatmul.mubr.f32.gmra.mrb[10].mxu0 %v864_v24 }
 0x6c3   : > { %v933_v49 = vpop.f32.mrb[4].mxu0 }
 0x6c4   : > { %v941_v51 = vmul.f32 %v933_v49, %v2819_v30  ;;  %v1799_v52 = vpop.f32.mrb[5].mxu0 }
 0x6c6   : > { %v942_v53 = vadd.f32 %v941_v51, %v940_v50 }
 0x6c8   : > { %v943_v54 = vadd.f32 %v942_v53, %v2822_v35 }
 0x6ca   : > { %v944_v47 = vmax.f32 %v943_v54, 0.0 }
 0x6cc   : > { %1380 = vst [vmem:[%s2742_s13 + $0x30] sm:$0xff] %v944_v47  ;;  %1833 = vmatmul.mubr.f32.vlgmr.msra.gmra.mrb[8].mxu1 %v944_v47  ;;  %1876 = vmatprep.mubr.f32.mxu0 %v944_v47  ;;  %v1017_v6 = vmul.f32 0.5, %v944_v47 }
 0x6ce   : > { %v1020_v12 = vadd.f32 %v1381_v9, %v1017_v6 }
 0x6e3   : > { %v1869_v56 = vpop.f32.mrb[6].mxu0 }
 0x6e4   : > { %v1131_v57 = vadd.f32 %v1869_v56, %v2971_v55  ;;  %v1125_v58 = vpop.f32.mrb[7].mxu0 }
 0x6e5   : > { %v1126_v59 = vadd.f32 %v2971_v55, %v1125_v58 }
 0x6e6   : > { %1165 = vst [vmem:[%s2740_s9 + $0x8] sm:$0xff] %v1131_v57 }
 0x6e7   : > { %1164 = vst [vmem:[%s2740_s9] sm:$0xff] %v1126_v59  ;;  %v1872_v60 = vpop.f32.mrb[8].mxu0 }
 0x6e8   : > { %v1141_v61 = vadd.f32 %v1872_v60, %v2971_v55  ;;  %v1135_v62 = vpop.f32.mrb[9].mxu0 }
 0x6e9   : > { %v1136_v63 = vadd.f32 %v2971_v55, %v1135_v62 }
 0x6ea   : > { %1167 = vst [vmem:[%s2740_s9 + $0x18] sm:$0xff] %v1141_v61 }
 0x6eb   : > { %1166 = vst [vmem:[%s2740_s9 + $0x10] sm:$0xff] %v1136_v63  ;;  %v1875_v0 = vpop.f32.mrb[10].mxu0 }
 0x6ec   : > { %v1151_v1 = vadd.f32 %v1875_v0, %v2971_v55  ;;  %v1145_v2 = vpop.f32.mrb[11].mxu0 }
 0x6ed   : > { %v1146_v3 = vadd.f32 %v2971_v55, %v1145_v2 }
 0x6ee   : > { %1169 = vst [vmem:[%s2740_s9 + $0x28] sm:$0xff] %v1151_v1 }
 0x6ef   : > { %1168 = vst [vmem:[%s2740_s9 + $0x20] sm:$0xff] %v1146_v3 }
 0x79f   : > { %v1013_v10 = vpop.f32.mrb[8].mxu1 }
 0x7a0   : > { %v1021_v13 = vmul.f32 %v1013_v10, %v2819_v30  ;;  %v1834_v15 = vpop.f32.mrb[9].mxu1 }
 0x7a2   : > { %v1022_v16 = vadd.f32 %v1021_v13, %v1020_v12 }
 0x7a4   : > { %v1023_v5 = vadd.f32 %v1022_v16, %v2822_v35 }
 0x7a6   : > { %v1024_v7 = vmax.f32 %v1023_v5, 0.0 }
 0x7a8   : > { %1382 = vst [vmem:[%s2742_s13 + $0x38] sm:$0xff] %v1024_v7  ;;  %1027 = vst [vmem:[#allocation2] sm:$0xff] %v1024_v7  ;;  %1877 = vmatmul.mubr.f32.gmra.mrb[12].mxu0 %v1024_v7 }
 0x7a9   : > { %2358 = shalt.err (!%p2355_p13)
}
 0x7aa   : > { %s2359_s13 = scalar_lea.hbm %s2995_s19, 1024  ;;  %s2363_s18 = scalar_lea.hbm %s3093_s7, 2048 }
 0x7ab   : > { %p2360_p5 = scmp.ne.s32.totalorder %s2995_s19, %s2359_s13  ;;  %p2364_p10 = scmp.lt.u32.totalorder %s2995_s19, %s3093_s7 }
 0x7ac   : > { %p2365_p2 = scmp.lt.u32.totalorder %s2363_s18, %s2359_s13  ;;  %p2367_p6 = scmp.lt.u32.totalorder %s2359_s13, %s2995_s19 }
 0x7ad   : > { %p2361_p12 = pnand %p2360_p5, %p2667_p1 }
 0x7ae   : > { %p2366_p4 = por %p2365_p2, %p2364_p10 }
 0x7af   : > { %p2362_p8 = pneg %p2361_p12 }
 0x7b0   : > { %p2368_p9 = por %p2367_p6, %p2366_p4 }
 0x7b2   : > { %p2369_p3 = pnand %p2368_p9, %p2362_p8 }
 0x7b4   : > { %2372 = shalt.err (!%p2369_p3)
}
 0x7b5   : > { %s2465_s10 = smov 128   ;;  %s2466_s30 = smov 8  }
 0x7b6   : > { %2122 = dma.vmem_to_hbm [thread:$0]  (%p2667_p1), %s2998_s15, 1024, %s2995_s19, %s1178_s12, %s2465_s10, %s2465_s10, %s2466_s30  }
 0x7b7   : > { %s1191_s13 = sshll.u32 %s2740_s9, 4  ;;  %s3035_s18 = scalar_lea.hbm %s3092_s6, %s1393_s17  ;;  %s3037_s13 = int_to_ptr.vmem [resolvable:$true] %s1191_s13 }
 0x7b8   : > { %s1173_s19 = scalar_lea.sflag [#allocation5], %s2722_s11  ;;  %s2373_s15 = scalar_lea.vmem %s3037_s13, 1024 }
 0x7b9   : > { %p2374_p7 = scmp.ne.s32.totalorder %s3037_s13, %s2373_s15  ;;  %s2467_s12 = smov [#allocation12]  }
 0x7ba   : > { %s2377_s28 = sshll.u32 %s2467_s12, 4  ;;  %s2378_s28 = int_to_ptr.vmem [resolvable:$false] %s2377_s28 }
 0x7bb   : > { %p2375_p11 = pnand %p2374_p7, %p2667_p1  ;;  %s2379_s23 = scalar_lea.vmem %s2378_s28, 2048 }
 0x7bc   : > { %p2380_p13 = scmp.lt.s32.totalorder %s3037_s13, %s2378_s28  ;;  %p2381_p5 = scmp.lt.s32.totalorder %s2379_s23, %s2373_s15 }
 0x7bd   : > { %p2376_p0 = pneg %p2375_p11 }
 0x7be   : > { %p2382_p12 = por %p2381_p5, %p2380_p13 }
 0x7c0   : > { %p2383_p8 = pnand %p2382_p12, %p2376_p0 }
 0x87b   : > { %v1878_v30 = vpop.f32.mrb[12].mxu0 }
 0x87c   : > { %v1161_v35 = vadd.f32 %v1878_v30, %v2971_v55  ;;  %v1155_v8 = vpop.f32.mrb[13].mxu0 }
 0x87d   : > { %v1156_v11 = vadd.f32 %v2971_v55, %v1155_v8 }
 0x87e   : > { %1171 = vst [vmem:[%s2740_s9 + $0x38] sm:$0xff] %v1161_v35 }
 0x87f   : > { %1170 = vst [vmem:[%s2740_s9 + $0x30] sm:$0xff] %v1156_v11 }
 0x880   : > { %2386 = shalt.err (!%p2383_p8)
}
 0x881   : > { %s2387_s9 = scalar_lea.hbm %s3035_s18, 1024  ;;  %s2391_s16 = scalar_lea.hbm %s3092_s6, 2048 }
 0x882   : > { %p2388_p10 = scmp.ne.s32.totalorder %s3035_s18, %s2387_s9  ;;  %p2392_p6 = scmp.lt.u32.totalorder %s3035_s18, %s3092_s6 }
 0x883   : > { %p2393_p9 = scmp.lt.u32.totalorder %s2391_s16, %s2387_s9  ;;  %p2395_p7 = scmp.lt.u32.totalorder %s2387_s9, %s3035_s18 }
 0x884   : > { %p2389_p2 = pnand %p2388_p10, %p2667_p1 }
 0x885   : > { %p2394_p3 = por %p2393_p9, %p2392_p6 }
 0x886   : > { %p2390_p4 = pneg %p2389_p2 }
 0x887   : > { %p2396_p11 = por %p2395_p7, %p2394_p3 }
 0x889   : > { %p2397_p0 = pnand %p2396_p11, %p2390_p4 }
 0x88b   : > { %2400 = shalt.err (!%p2397_p0)
}
 0x88c   : > { %2121 = dma.vmem_to_hbm [thread:$0]  (%p2667_p1), %s3037_s13, 1024, %s3035_s18, %s1173_s19, %s2465_s10, %s2465_s10, %s2466_s30  }
 0x88d PF: > { %s1222_s15 = sand.u32 1, %s2439_s24   ;;  %p3117_p13 = scmp.ne.s32.totalorder %s3101_s8, 0 }
 0x88e   : > { %p3118_p5 = scmp.ge.s32.totalorder %s2451_s27, 2  ;;  %s1223_s28 = scalar_lea.sflag [#allocation5], %s1222_s15 }
 0x890   : > { %p2143_p12 = pnand %p3118_p5, %p3117_p13 }
 0x892   : > { %2430 = dma.done.wait (!%p2143_p12), %s1223_s28, 1024  }
 0x893   : > { %2432 = vsyncadd (!%p2143_p12), %s1223_s28, 4294966272  ;;  %s1232_s20 = scalar_lea.sflag [#allocation14], %s1222_s15 }
 0x894   : > { %2434 = dma.done.wait (!%p2143_p12), %s1232_s20, 1024  }
 0x895   : > { %2436 = vsyncadd (!%p2143_p12), %s1232_s20, 4294966272  ;;  %p26_p1 = scmp.ge.s32.totalorder %s2657_s22, 4   ;;  %s3119_s24 = smov %s2443_s25 }
 0x896   : > { %s3120_s25 = smov %s2447_s26  ;;  %s3121_s26 = smov %s2673_s21 }
 0x897   : > { %s3122_s27 = smov %s2657_s22  ;;  %28 = sbr.rel (!%p26_p1) target bundleno = 9 (0x9), region = 140 }
 0x89e   :  { %1237 = vsyncpa [#allocation4], 1 }
 0x89f   :  { %1239 = vsyncpa [#allocation4 + $0x1], 1 }
 0x8a0   :  { %1240 = vsyncpa [#allocation7], 1 }
 0x8a1   :  { %1241 = vsyncpa [#allocation10], 1 }
 0x8a2   :  { %1242 = vsyncpa [#allocation5], 1 }
 0x8a3   :  { %1244 = vsyncpa [#allocation5 + $0x1], 1 }
 0x8a4   :  { %1245 = vsyncpa [#allocation14], 1 }
 0x8a5   :  { %1247 = vsyncpa [#allocation14 + $0x1], 1 }

</bundles_post_ra>
